<compile_context>
chip_gen: v7x
topology: tpu7x:2x2x1
jax: 0.10.0
libtpu: 0.0.40
codegen_flags: <defaults>
</compile_context>

<pallas_src>
import functools

import jax
import jax.numpy as jnp
from jax.experimental import pallas as pl
from jax.experimental.pallas import tpu as pltpu


# ----------------------------------------------------------------------------
# Pallas kernel: fused 3-layer MLP (Linear+ReLU, NoisyLinear+ReLU, NoisyLinear)
# f32 x loaded and cast to bf16 in-kernel; bf16 operands, f32 MXU accumulation,
# bf16 lane-dense output store.
# ----------------------------------------------------------------------------
def noisy_dqn_kernel(x_ref, w1_ref, b1_ref, w2_ref, b2_ref, w3_ref, b3_ref,
                     out_ref):
    x = x_ref[...].astype(jnp.bfloat16)                               # [tb, D_in]
    h1 = jnp.dot(x, w1_ref[...], preferred_element_type=jnp.float32)
    h1 = jnp.maximum(h1 + b1_ref[...], 0.0).astype(jnp.bfloat16)      # [tb, 128]
    h2 = jnp.dot(h1, w2_ref[...], preferred_element_type=jnp.float32)
    h2 = jnp.maximum(h2 + b2_ref[...], 0.0).astype(jnp.bfloat16)      # [tb, 128]
    q = jnp.dot(h2, w3_ref[...], preferred_element_type=jnp.float32)
    out_ref[...] = (q + b3_ref[...]).astype(out_ref.dtype)            # bf16 store


def _round_up(x, m):
    return ((x + m - 1) // m) * m


def _cdiv(a, b):
    return (a + b - 1) // b


_MIN_TILE = 16          # bf16 packs 16 rows per sublane group
_SINGLE_STEP_MAX = 256  # below this the call is latency-bound; 1 grid step


# ----------------------------------------------------------------------------
# Wrapper: padding, dtype casts, BlockSpecs / grid.
# Weights are [in_features, out_features]; biases are 1-D [out_features].
# ----------------------------------------------------------------------------
@functools.partial(jax.jit, static_argnames=("block_b",))
def noisy_dqn_forward(x, w1, b1, w2, b2, w3, b3, *, block_b=1024):
    B, d_in = x.shape
    hidden = w1.shape[1]
    d_out = w3.shape[1]

    # ---- lane-dense output: pad final layer width to a multiple of 128 ----
    d_out_p = max(_round_up(d_out, 128), 128)
    w3p = jnp.zeros((hidden, d_out_p), jnp.float32).at[:, :d_out].set(w3)
    b3p = jnp.zeros((1, d_out_p), jnp.float32).at[:, :d_out].set(
        b3.reshape(1, -1))

    # ---- batch tiling ----
    if B <= _SINGLE_STEP_MAX:
        tb = _round_up(B, _MIN_TILE)                       # grid = (1,)
    else:
        # >= 2 grid steps so the "parallel" batch axis can use both
        # TensorCores on v7x; cap the tile at block_b to bound VMEM.
        tb = min(block_b, _round_up(_cdiv(B, 2), _MIN_TILE))
    B_pad = _round_up(B, tb)
    if B_pad != B:
        x = jnp.pad(x, ((0, B_pad - B), (0, 0)))

    # ---- bf16 weights (resident), f32 biases added to the f32 accumulator ----
    xf = x.astype(jnp.float32)                 # no-op if already f32; cast to bf16 in-kernel
    w1b = w1.astype(jnp.bfloat16)
    w2b = w2.astype(jnp.bfloat16)
    w3b = w3p.astype(jnp.bfloat16)
    b1r = b1.reshape(1, -1).astype(jnp.float32)
    b2r = b2.reshape(1, -1).astype(jnp.float32)

    grid = (B_pad // tb,)
    resident = lambda shape: pl.BlockSpec(shape, lambda i: (0, 0))

    out = pl.pallas_call(
        noisy_dqn_kernel,
        out_shape=jax.ShapeDtypeStruct((B_pad, d_out_p), jnp.bfloat16),
        grid_spec=pltpu.PrefetchScalarGridSpec(
            num_scalar_prefetch=0,
            grid=grid,
            in_specs=[
                pl.BlockSpec((tb, d_in), lambda i: (i, 0)),   # x tile (f32 in HBM)
                resident((d_in, hidden)),                     # W1
                resident((1, hidden)),                        # b1
                resident((hidden, hidden)),                   # W2
                resident((1, hidden)),                        # b2
                resident((hidden, d_out_p)),                  # W3 (lane-padded)
                resident((1, d_out_p)),                       # b3 (lane-padded)
            ],
            out_specs=pl.BlockSpec((tb, d_out_p), lambda i: (i, 0)),
        ),
        compiler_params=pltpu.CompilerParams(
            dimension_semantics=("parallel",)),
        # VMEM use is tiny (< ~6 MB even at block_b=8192); if block_b is swept
        # far beyond that on v5e (16 MiB scoped default), set vmem_limit_bytes.
    )(xf, w1b, b1r, w2b, b2r, w3b, b3p)

    return out[:B, :d_out].astype(jnp.float32)


# ----------------------------------------------------------------------------
# Parameter construction (deterministic, mirrors PyTorch init semantics)
# ----------------------------------------------------------------------------
def _f(x):
    # factorized-noise transform f(x) = sign(x) * sqrt(|x|)
    return jnp.sign(x) * jnp.sqrt(jnp.abs(x))


def make_linear_params(key, in_f, out_f):
    # nn.Linear default init: U(-1/sqrt(in_f), 1/sqrt(in_f)) for W and b.
    k_w, k_b = jax.random.split(key)
    bound = 1.0 / jnp.sqrt(jnp.float32(in_f))
    w = jax.random.uniform(k_w, (out_f, in_f), jnp.float32, -bound, bound)
    b = jax.random.uniform(k_b, (out_f,), jnp.float32, -bound, bound)
    return w, b


def make_factorized_noisy_params(key, in_f, out_f, sigma_init=0.5):
    # mu ~ U(-1/sqrt(in), 1/sqrt(in)); sigma = sigma_init / sqrt(in);
    # eps_in, eps_out ~ N(0, 1);  W = mu + sigma * f(eps_out) f(eps_in)^T
    k_wm, k_bm, k_ei, k_eo = jax.random.split(key, 4)
    bound = 1.0 / jnp.sqrt(jnp.float32(in_f))
    w_mu = jax.random.uniform(k_wm, (out_f, in_f), jnp.float32, -bound, bound)
    b_mu = jax.random.uniform(k_bm, (out_f,), jnp.float32, -bound, bound)
    w_sigma = jnp.full((out_f, in_f), sigma_init / jnp.sqrt(jnp.float32(in_f)),
                       jnp.float32)
    b_sigma = jnp.full((out_f,), sigma_init / jnp.sqrt(jnp.float32(in_f)),
                       jnp.float32)
    eps_in = _f(jax.random.normal(k_ei, (in_f,), jnp.float32))
    eps_out = _f(jax.random.normal(k_eo, (out_f,), jnp.float32))
    w = w_mu + w_sigma * jnp.outer(eps_out, eps_in)
    b = b_mu + b_sigma * eps_out
    return w, b


def reference_forward(x, w1, b1, w2, b2, w3, b3):
    # Pure f32 reference of the module's forward.
    h1 = jnp.maximum(x @ w1 + b1, 0.0)
    h2 = jnp.maximum(h1 @ w2 + b2, 0.0)
    return h2 @ w3 + b3


if __name__ == "__main__":
    # Small shapes consistent with the module: state is a flat feature vector.
    input_dim = (16,)   # self.input_dim ; Linear uses input_dim[0]
    output_dim = 4      # number of actions
    hidden = 128
    batch = 8

    key = jax.random.PRNGKey(0)
    k_x, k_l1, k_l2, k_l3, k_x2 = jax.random.split(key, 5)

    w1_t, b1 = make_linear_params(k_l1, input_dim[0], hidden)            # [128,16]
    w2_t, b2 = make_factorized_noisy_params(k_l2, hidden, hidden)        # [128,128]
    w3_t, b3 = make_factorized_noisy_params(k_l3, hidden, output_dim)    # [4,128]

    # Kernel expects weights as [in, out]; biases stay 1-D.
    w1, w2, w3 = w1_t.T, w2_t.T, w3_t.T

    # --- tiny batch: latency path, grid=(1,), rows padded to 16 ---
    x = jax.random.normal(k_x, (batch, input_dim[0]), jnp.float32)
    qvals = jax.block_until_ready(noisy_dqn_forward(x, w1, b1, w2, b2, w3, b3))
    ref = reference_forward(x, w1, b1, w2, b2, w3, b3)
    assert qvals.shape == (batch, output_dim)
    # bf16 operands / bf16 output store with f32 accumulate -> relaxed tolerance.
    assert jnp.allclose(qvals, ref, atol=5e-2, rtol=5e-2), "mismatch (tiny batch)"

    # --- non-multiple batch with 128-row tiles: padding + 5-step parallel grid ---
    x2 = jax.random.normal(k_x2, (600, input_dim[0]), jnp.float32)
    qvals2 = jax.block_until_ready(
        noisy_dqn_forward(x2, w1, b1, w2, b2, w3, b3, block_b=128))
    ref2 = reference_forward(x2, w1, b1, w2, b2, w3, b3)
    assert qvals2.shape == (600, output_dim)
    assert jnp.allclose(qvals2, ref2, atol=5e-2, rtol=5e-2), "mismatch (tiled batch)"

    print("KERNEL_OK")
</pallas_src>

<mosaic_0001>
module attributes {stable_mosaic.version = 11 : i64} {
  func.func @noisy_dqn_kernel(%arg0: i32, %arg1: memref<16x16xf32, #tpu.memory_space<vmem>>, %arg2: memref<16x128xbf16, #tpu.memory_space<vmem>>, %arg3: memref<1x128xf32, #tpu.memory_space<vmem>>, %arg4: memref<128x128xbf16, #tpu.memory_space<vmem>>, %arg5: memref<1x128xf32, #tpu.memory_space<vmem>>, %arg6: memref<128x128xbf16, #tpu.memory_space<vmem>>, %arg7: memref<1x128xf32, #tpu.memory_space<vmem>>, %arg8: memref<16x128xbf16, #tpu.memory_space<vmem>>) attributes {dimension_semantics = [#tpu.dimension_semantics<parallel>], iteration_bounds = array<i64: 1>, scalar_prefetch = 0 : i64, scratch_operands = 0 : i64, tpu.core_type = #tpu.core_type<tc>, window_params = [{transform_indices = @transform_0, window_bounds = array<i64: 16, 16>}, {pipeline_mode = #tpu.pipeline_mode<synchronous>, transform_indices = @transform_1, window_bounds = array<i64: 16, 128>}, {pipeline_mode = #tpu.pipeline_mode<synchronous>, transform_indices = @transform_2, window_bounds = array<i64: 1, 128>}, {pipeline_mode = #tpu.pipeline_mode<synchronous>, transform_indices = @transform_3, window_bounds = array<i64: 128, 128>}, {pipeline_mode = #tpu.pipeline_mode<synchronous>, transform_indices = @transform_4, window_bounds = array<i64: 1, 128>}, {pipeline_mode = #tpu.pipeline_mode<synchronous>, transform_indices = @transform_5, window_bounds = array<i64: 128, 128>}, {pipeline_mode = #tpu.pipeline_mode<synchronous>, transform_indices = @transform_6, window_bounds = array<i64: 1, 128>}, {transform_indices = @transform_7, window_bounds = array<i64: 16, 128>}]} {
    %c0 = arith.constant 0 : index
    %c0_0 = arith.constant 0 : index
    %0 = vector.load %arg1[%c0, %c0_0] : memref<16x16xf32, #tpu.memory_space<vmem>>, vector<16x16xf32>
    %1 = arith.truncf %0 : vector<16x16xf32> to vector<16x16xbf16>
    %c0_1 = arith.constant 0 : index
    %c0_2 = arith.constant 0 : index
    %2 = vector.load %arg2[%c0_1, %c0_2] : memref<16x128xbf16, #tpu.memory_space<vmem>>, vector<16x128xbf16>
    %cst = arith.constant dense<0.000000e+00> : vector<16x128xf32>
    %3 = tpu.matmul %1, %2, %cst {dimension_numbers = #tpu.dot_dimension_numbers<[1], [0], [0], [1], [0, 0, 1, 1], [], []>} : vector<16x16xbf16>, vector<16x128xbf16>, vector<16x128xf32> -> vector<16x128xf32>
    %c0_3 = arith.constant 0 : index
    %c0_4 = arith.constant 0 : index
    %4 = vector.load %arg3[%c0_3, %c0_4] : memref<1x128xf32, #tpu.memory_space<vmem>>, vector<1x128xf32>
    %5 = vector.broadcast %4 : vector<1x128xf32> to vector<16x128xf32>
    %6 = arith.addf %3, %5 : vector<16x128xf32>
    %cst_5 = arith.constant 0.000000e+00 : f32
    %7 = vector.broadcast %cst_5 : f32 to vector<16x128xf32>
    %8 = arith.maximumf %6, %7 : vector<16x128xf32>
    %9 = arith.truncf %8 : vector<16x128xf32> to vector<16x128xbf16>
    %c0_6 = arith.constant 0 : index
    %c0_7 = arith.constant 0 : index
    %10 = vector.load %arg4[%c0_6, %c0_7] : memref<128x128xbf16, #tpu.memory_space<vmem>>, vector<128x128xbf16>
    %cst_8 = arith.constant dense<0.000000e+00> : vector<16x128xf32>
    %11 = tpu.matmul %9, %10, %cst_8 {dimension_numbers = #tpu.dot_dimension_numbers<[1], [0], [0], [1], [0, 0, 1, 1], [], []>} : vector<16x128xbf16>, vector<128x128xbf16>, vector<16x128xf32> -> vector<16x128xf32>
    %c0_9 = arith.constant 0 : index
    %c0_10 = arith.constant 0 : index
    %12 = vector.load %arg5[%c0_9, %c0_10] : memref<1x128xf32, #tpu.memory_space<vmem>>, vector<1x128xf32>
    %13 = vector.broadcast %12 : vector<1x128xf32> to vector<16x128xf32>
    %14 = arith.addf %11, %13 : vector<16x128xf32>
    %cst_11 = arith.constant 0.000000e+00 : f32
    %15 = vector.broadcast %cst_11 : f32 to vector<16x128xf32>
    %16 = arith.maximumf %14, %15 : vector<16x128xf32>
    %17 = arith.truncf %16 : vector<16x128xf32> to vector<16x128xbf16>
    %c0_12 = arith.constant 0 : index
    %c0_13 = arith.constant 0 : index
    %18 = vector.load %arg6[%c0_12, %c0_13] : memref<128x128xbf16, #tpu.memory_space<vmem>>, vector<128x128xbf16>
    %cst_14 = arith.constant dense<0.000000e+00> : vector<16x128xf32>
    %19 = tpu.matmul %17, %18, %cst_14 {dimension_numbers = #tpu.dot_dimension_numbers<[1], [0], [0], [1], [0, 0, 1, 1], [], []>} : vector<16x128xbf16>, vector<128x128xbf16>, vector<16x128xf32> -> vector<16x128xf32>
    %c0_15 = arith.constant 0 : index
    %c0_16 = arith.constant 0 : index
    %20 = vector.load %arg7[%c0_15, %c0_16] : memref<1x128xf32, #tpu.memory_space<vmem>>, vector<1x128xf32>
    %21 = vector.broadcast %20 : vector<1x128xf32> to vector<16x128xf32>
    %22 = arith.addf %19, %21 : vector<16x128xf32>
    %23 = arith.truncf %22 : vector<16x128xf32> to vector<16x128xbf16>
    %c0_17 = arith.constant 0 : index
    %c0_18 = arith.constant 0 : index
    %24 = vector.load %arg8[%c0_17, %c0_18] : memref<16x128xbf16, #tpu.memory_space<vmem>>, vector<16x128xbf16>
    tpu.vector_store %arg8[%c0_17, %c0_18], %23 {strides = array<i32>} : memref<16x128xbf16, #tpu.memory_space<vmem>>, vector<16x128xbf16>,
    return
  }
  func.func @transform_0(%arg0: i32) -> (i32, i32) {
    %c0_i32 = arith.constant 0 : i32
    %c0_i32_0 = arith.constant 0 : i32
    return %arg0, %c0_i32 : i32, i32
  }
  func.func @transform_1(%arg0: i32) -> (i32, i32) {
    %c0_i32 = arith.constant 0 : i32
    %c0_i32_0 = arith.constant 0 : i32
    %c0_i32_1 = arith.constant 0 : i32
    return %c0_i32, %c0_i32_0 : i32, i32
  }
  func.func @transform_2(%arg0: i32) -> (i32, i32) {
    %c0_i32 = arith.constant 0 : i32
    %c0_i32_0 = arith.constant 0 : i32
    %c0_i32_1 = arith.constant 0 : i32
    return %c0_i32, %c0_i32_0 : i32, i32
  }
  func.func @transform_3(%arg0: i32) -> (i32, i32) {
    %c0_i32 = arith.constant 0 : i32
    %c0_i32_0 = arith.constant 0 : i32
    %c0_i32_1 = arith.constant 0 : i32
    return %c0_i32, %c0_i32_0 : i32, i32
  }
  func.func @transform_4(%arg0: i32) -> (i32, i32) {
    %c0_i32 = arith.constant 0 : i32
    %c0_i32_0 = arith.constant 0 : i32
    %c0_i32_1 = arith.constant 0 : i32
    return %c0_i32, %c0_i32_0 : i32, i32
  }
  func.func @transform_5(%arg0: i32) -> (i32, i32) {
    %c0_i32 = arith.constant 0 : i32
    %c0_i32_0 = arith.constant 0 : i32
    %c0_i32_1 = arith.constant 0 : i32
    return %c0_i32, %c0_i32_0 : i32, i32
  }
  func.func @transform_6(%arg0: i32) -> (i32, i32) {
    %c0_i32 = arith.constant 0 : i32
    %c0_i32_0 = arith.constant 0 : i32
    %c0_i32_1 = arith.constant 0 : i32
    return %c0_i32, %c0_i32_0 : i32, i32
  }
  func.func @transform_7(%arg0: i32) -> (i32, i32) {
    %c0_i32 = arith.constant 0 : i32
    %c0_i32_0 = arith.constant 0 : i32
    return %arg0, %c0_i32 : i32, i32
  }
}

</mosaic_0001>

<bundles_post_ra>
// kernel: noisy_dqn_forward.1
= control target key start
LH: loop header
LB: loop body
LE: loop exit
PB: predicated region body
PF: predicated region fallthrough
CT: control target
= control target key end

     0   :  { %v449_v0 = vmov 0.0   ;;  %vm450_vm0 = vmmov 0   ;;  %vm45_vm1 = vcmask 130048   ;;  %s580_s1 = inlined_call_operand.vmem [shape: bf16[16,128], index: 1, kind: input, shape index: {}]   ;;  %s581_s0 = inlined_call_operand.vmem [shape: f32[16,16], index: 0, kind: input, shape index: {}]   ;;  %s582_s3 = inlined_call_operand.vmem [shape: bf16[128,128], index: 3, kind: input, shape index: {}]   ;;  %s583_s5 = inlined_call_operand.vmem [shape: bf16[128,128], index: 5, kind: input, shape index: {}]   ;;  %s584_s2 = inlined_call_operand.vmem [shape: f32[1,128], index: 2, kind: input, shape index: {}]   ;;  %s585_s4 = inlined_call_operand.vmem [shape: f32[1,128], index: 4, kind: input, shape index: {}]   ;;  %s586_s6 = inlined_call_operand.vmem [shape: f32[1,128], index: 6, kind: input, shape index: {}]   ;;  %s587_s7 = inlined_call_operand.vmem [shape: bf16[16,128], index: 7, kind: output, shape index: {}]  }
   0x1   :  { %384 = vmatprep.subr.bf16.mxu0 %v449_v0  ;;  %v432_v1 = vld [vmem:[%s580_s1] sm:$0xff]   ;;  %386 = vmatprep.mubr.msk.bf16.mxu0 %vm450_vm0, %v449_v0  ;;  %v28_v3 = vld [vmem:[%s581_s0 + $0x8] sm:$0xff]  ;;  %v435_v7 = vld [vmem:[%s582_s3 + $0x10] sm:$0xff]  }
   0x2   :  { %v27_v2 = vld [vmem:[%s581_s0] sm:$0xff]  ;;  %390 = vmatprep.subr.bf16.mxu1 %v449_v0  ;;  %406 = vmatprep.mubr.msk.bf16.mxu1 %vm450_vm0, %v449_v0  ;;  %v434_v6 = vld [vmem:[%s582_s3 + $0x8] sm:$0xff]   ;;  %v436_v8 = vld [vmem:[%s582_s3 + $0x18] sm:$0xff]  }
   0x3   :  { %385 = vmatpush3.bf16.msra.mxu0 %v432_v1  ;;  %v29_v4 = vpack.c.bf16 %v28_v3, %v27_v2  ;;  %v433_v5 = vld [vmem:[%s582_s3] sm:$0xff]   ;;  %v438_v10 = vld [vmem:[%s582_s3 + $0x28] sm:$0xff]   ;;  %v439_v11 = vld [vmem:[%s582_s3 + $0x30] sm:$0xff]  }
   0x4   :  { %410 = vmatprep.subr.bf16.mxu0 %v449_v0  ;;  %391 = vmatpush3.bf16.msra.mxu1 %v433_v5  ;;  %v437_v9 = vld [vmem:[%s582_s3 + $0x20] sm:$0xff]   ;;  %v440_v12 = vld [vmem:[%s582_s3 + $0x38] sm:$0xff]   ;;  %v442_v14 = vld [vmem:[%s583_s5 + $0x8] sm:$0xff]  }
   0x5   :  { %392 = vmatprep.subr.bf16.mxu1 %v449_v0  ;;  %v441_v13 = vld [vmem:[%s583_s5] sm:$0xff]   ;;  %v443_v15 = vld [vmem:[%s583_s5 + $0x10] sm:$0xff]   ;;  %v444_v16 = vld [vmem:[%s583_s5 + $0x18] sm:$0xff]  }
   0x6   :  { %387 = vmatmul.mubr.msk.bf16.vlgmr.msra.gmra.mrb[0].mxu0 %vm45_vm1, %v29_v4  ;;  %v445_v17 = vld [vmem:[%s583_s5 + $0x20] sm:$0xff]   ;;  %v446_v18 = vld [vmem:[%s583_s5 + $0x28] sm:$0xff]   ;;  %v447_v29 = vld [vmem:[%s583_s5 + $0x30] sm:$0xff]  }
   0x7   :  { %426 = vmatprep.mubr.msk.bf16.mxu0 %vm450_vm0, %v449_v0  ;;  %411 = vmatpush3.bf16.msra.mxu0 %v441_v13  ;;  %v334_v19 = vld [vmem:[%s584_s2] ss:$0 sm:$0xff]  ;;  %v448_v30 = vld [vmem:[%s583_s5 + $0x38] sm:$0xff]  }
   0x8   :  { %393 = vmatpush3.bf16.msra.mxu1 %v434_v6  ;;  %412 = vmatprep.subr.bf16.mxu0 %v449_v0  ;;  %v337_v31 = vld [vmem:[%s585_s4] ss:$0 sm:$0xff] }
   0x9   :  { %394 = vmatprep.subr.bf16.mxu1 %v449_v0  ;;  %v346_v41 = vld [vmem:[%s586_s6] ss:$0 sm:$0xff] }
   0xb   :  { %413 = vmatpush3.bf16.msra.mxu0 %v442_v14 }
   0xc   :  { %395 = vmatpush3.bf16.msra.mxu1 %v435_v7  ;;  %414 = vmatprep.subr.bf16.mxu0 %v449_v0 }
   0xd   :  { %396 = vmatprep.subr.bf16.mxu1 %v449_v0 }
   0xf   :  { %415 = vmatpush3.bf16.msra.mxu0 %v443_v15 }
  0x10   :  { %397 = vmatpush3.bf16.msra.mxu1 %v436_v8  ;;  %416 = vmatprep.subr.bf16.mxu0 %v449_v0 }
  0x11   :  { %398 = vmatprep.subr.bf16.mxu1 %v449_v0 }
  0x13   :  { %417 = vmatpush3.bf16.msra.mxu0 %v444_v16 }
  0x14   :  { %399 = vmatpush3.bf16.msra.mxu1 %v437_v9  ;;  %418 = vmatprep.subr.bf16.mxu0 %v449_v0 }
  0x15   :  { %400 = vmatprep.subr.bf16.mxu1 %v449_v0 }
  0x17   :  { %419 = vmatpush3.bf16.msra.mxu0 %v445_v17 }
  0x18   :  { %401 = vmatpush3.bf16.msra.mxu1 %v438_v10  ;;  %420 = vmatprep.subr.bf16.mxu0 %v449_v0 }
  0x19   :  { %402 = vmatprep.subr.bf16.mxu1 %v449_v0 }
  0x1b   :  { %421 = vmatpush3.bf16.msra.mxu0 %v446_v18 }
  0x1c   :  { %403 = vmatpush3.bf16.msra.mxu1 %v439_v11  ;;  %422 = vmatprep.subr.bf16.mxu0 %v449_v0 }
  0x1d   :  { %404 = vmatprep.subr.bf16.mxu1 %v449_v0 }
  0x1f   :  { %423 = vmatpush3.bf16.msra.mxu0 %v447_v29 }
  0x20   :  { %405 = vmatpush3.bf16.msra.mxu1 %v440_v12  ;;  %424 = vmatprep.subr.bf16.mxu0 %v449_v0 }
  0x23   :  { %425 = vmatpush3.bf16.msra.mxu0 %v448_v30 }
  0xd9   :  { %v83_v20 = vpop.f32.mrb[0].mxu0 }
  0xda   :  { %v84_v21 = vadd.f32 %v334_v19, %v83_v20  ;;  %v388_v22 = vpop.f32.mrb[1].mxu0 }
  0xdb   :  { %v86_v23 = vpop.f32.mrb[2].mxu0 }
  0xdc   :  { %v87_v24 = vadd.f32 %v334_v19, %v86_v23  ;;  %v389_v25 = vpop.f32.mrb[3].mxu0  ;;  %v90_v26 = vmax.f32 %v84_v21, 0.0 }
  0xde   :  { %v91_v27 = vmax.f32 %v87_v24, 0.0 }
  0xe0   :  { %v92_v28 = vpack.c.bf16 %v91_v27, %v90_v26 }
  0xe2   :  { %407 = vmatmul.mubr.bf16.vlgmr.msra.gmra.mrb[0].mxu1 %v92_v28 }
 0x1b5   :  { %v198_v32 = vpop.f32.mrb[0].mxu1 }
 0x1b6   :  { %v199_v33 = vadd.f32 %v337_v31, %v198_v32  ;;  %v408_v34 = vpop.f32.mrb[1].mxu1 }
 0x1b7   :  { %v201_v35 = vpop.f32.mrb[2].mxu1 }
 0x1b8   :  { %v202_v36 = vadd.f32 %v337_v31, %v201_v35  ;;  %v409_v37 = vpop.f32.mrb[3].mxu1  ;;  %v205_v38 = vmax.f32 %v199_v33, 0.0 }
 0x1ba   :  { %v206_v39 = vmax.f32 %v202_v36, 0.0 }
 0x1bc   :  { %v207_v40 = vpack.c.bf16 %v206_v39, %v205_v38 }
 0x1be   :  { %427 = vmatmul.mubr.bf16.vlgmr.msra.gmra.mrb[4].mxu0 %v207_v40 }
 0x291   :  { %v313_v42 = vpop.f32.mrb[4].mxu0 }
 0x292   :  { %v428_v43 = vpop.f32.mrb[5].mxu0  ;;  %v314_v45 = vadd.f32 %v346_v41, %v313_v42 }
 0x293   :  { %v316_v44 = vpop.f32.mrb[6].mxu0 }
 0x294   :  { %v317_v46 = vadd.f32 %v346_v41, %v316_v44  ;;  %v429_v47 = vpop.f32.mrb[7].mxu0 }
 0x296   :  { %v362_v48 = vpack.c.bf16 %v317_v46, %v314_v45 }
 0x298   :  { %363 = vst [vmem:[%s587_s7] sm:$0xff] %v362_v48  }

</bundles_post_ra>
